<compile_context>
chip_gen: v7x
topology: tpu7x:2x2x1
jax: 0.10.0
libtpu: 0.0.40
codegen_flags: <defaults>
</compile_context>

<pallas_src>
import functools

import jax
import jax.numpy as jnp
from jax.experimental import pallas as pl
from jax.experimental.pallas import tpu as pltpu

_NEG_FILL = -1e30   # bias fill for padded logit columns: exp() underflows to 0
_LANE = 128         # TPU lane width; class dim padded to a multiple of this


def _round_up(x, m):
    return ((x + m - 1) // m) * m


def _pick_tile_n(n, d, c_pad, itemsize=4):
    """Largest row tile that keeps the streamed working set well inside VMEM.

    Budget is sized against v7x's 32 MiB scoped / 64 MiB physical VMEM (the
    tightest generation); v5e/v6e simply get the same comfortable tile.
    """
    per_row = 2 * (d + 2 * c_pad) * itemsize   # x + label + logits, double-buffered
    budget = 12 * 1024 * 1024
    cap = max(8, min(1024, budget // per_row))
    cap = (cap // 8) * 8
    return max(8, min(cap, _round_up(n, 8)))


def _classifier_loss_kernel(x_ref, w_ref, b_ref, label_ref,
                            logits_ref, losspart_ref, *, n_rows):
    """One row-tile of fused linear forward + CE-with-logits partial loss.

    x_ref:        (TILE_N, D)      feature rows for this tile (streamed)
    w_ref:        (D, C_PAD)       weight, zero-padded columns (VMEM-resident)
    b_ref:        (1, C_PAD)       bias, padded columns = -1e30 (VMEM-resident)
    label_ref:    (TILE_N, C_PAD)  one-hot labels, zero-padded rows/columns
    logits_ref:   (TILE_N, C_PAD)  lane-dense logits writeback
    losspart_ref: (1, 8, 128)      per-tile partial sum of (y_pred - lse)
    """
    tile_n = x_ref.shape[0]

    # forward: linear head on the MXU, f32 accumulation.
    logits = jnp.dot(x_ref[...], w_ref[...],
                     preferred_element_type=jnp.float32) + b_ref[...]
    logits_ref[...] = logits.astype(logits_ref.dtype)

    # calc_loss pieces. Padded columns carry -1e30 logits (exp -> 0) and zero
    # labels, so they contribute nothing to y_pred or logsumexp.
    y_pred = jnp.sum(logits * label_ref[...].astype(jnp.float32),
                     axis=-1, keepdims=True)                          # (TILE_N, 1)
    m = jnp.max(logits, axis=-1, keepdims=True)                       # (TILE_N, 1)
    lse = m + jnp.log(jnp.sum(jnp.exp(logits - m), axis=-1, keepdims=True))
    per_row = y_pred - lse                                            # (TILE_N, 1)

    # Mask rows that exist only because N was padded up to a tile multiple.
    row0 = pl.program_id(0) * tile_n
    rows = row0 + jax.lax.broadcasted_iota(jnp.int32, (tile_n, 1), 0)
    tile_sum = jnp.sum(jnp.where(rows < n_rows, per_row, 0.0),
                       keepdims=True)                                 # (1, 1)

    losspart_ref[...] = jnp.broadcast_to(tile_sum.reshape(1, 1, 1),
                                         losspart_ref.shape)


@functools.partial(jax.jit, static_argnames=("reduce_time", "tile_n"))
def classifier_calc_loss(x, label, w, b, *, reduce_time=True, tile_n=None):
    """JAX/Pallas equivalent of Classifier.calc_loss (also returns pred).

    Args:
        x:     (B, T, D) float input (f32 or bf16)
        label: (B, T, C) one-hot labels
        w:     (D, C)    linear weight (f32 or bf16)
        b:     (C,)      linear bias
        reduce_time: if True, predict only from the last timestep (pred (B, C));
                     otherwise predict per-timestep (pred (B, T, C)).
        tile_n: optional row-tile override (testing / tuning).

    Returns:
        (pred, loss): pred of shape (B, C) or (B, T, C); loss is a scalar.
    """
    B, T, D = x.shape
    C = label.shape[-1]

    if reduce_time:
        # TODO(synk): the last-timestep select could be folded into the BlockSpec
        # index_map (pl.Squeezed over T) to skip this XLA slice; kept explicit.
        x2 = x[:, -1, :]
        label2 = label[:, -1, :]
        N = B
    else:
        x2 = x.reshape(B * T, D)
        label2 = label.reshape(B * T, C)
        N = B * T

    C_PAD = _round_up(C, _LANE)
    if tile_n is None:
        TILE_N = _pick_tile_n(N, D, C_PAD)
    else:
        TILE_N = max(8, _round_up(int(tile_n), 8))
    grid = pl.cdiv(N, TILE_N)
    N_PAD = grid * TILE_N

    # Pad rows up to the grid extent and the class dim up to 128 lanes.
    x_p = jnp.pad(x2, ((0, N_PAD - N), (0, 0)))
    label_p = jnp.pad(label2.astype(jnp.float32),
                      ((0, N_PAD - N), (0, C_PAD - C)))
    w_p = jnp.pad(w, ((0, 0), (0, C_PAD - C)))
    b_p = jnp.pad(b.astype(jnp.float32), (0, C_PAD - C),
                  constant_values=_NEG_FILL).reshape(1, C_PAD)

    kernel = functools.partial(_classifier_loss_kernel, n_rows=N)

    logits_p, loss_parts = pl.pallas_call(
        kernel,
        grid=(grid,),
        in_specs=[
            pl.BlockSpec((TILE_N, D), lambda i: (i, 0)),        # x tile (streamed)
            pl.BlockSpec((D, C_PAD), lambda i: (0, 0)),         # w (resident)
            pl.BlockSpec((1, C_PAD), lambda i: (0, 0)),         # b (resident)
            pl.BlockSpec((TILE_N, C_PAD), lambda i: (i, 0)),    # label tile
        ],
        out_specs=(
            pl.BlockSpec((TILE_N, C_PAD), lambda i: (i, 0)),    # lane-dense logits
            pl.BlockSpec((1, 8, _LANE), lambda i: (i, 0, 0)),   # per-tile partials
        ),
        out_shape=(
            jax.ShapeDtypeStruct((N_PAD, C_PAD), jnp.float32),
            jax.ShapeDtypeStruct((grid, 8, _LANE), jnp.float32),
        ),
        compiler_params=pltpu.CompilerParams(
            dimension_semantics=("parallel",),
            vmem_limit_bytes=32 * 1024 * 1024,
        ),
    )(x_p, w_p, b_p, label_p)

    loss = -jnp.sum(loss_parts[:, 0, 0]) / jnp.float32(N)
    pred = logits_p[:N, :C]
    if not reduce_time:
        pred = pred.reshape(B, T, C)
    return pred, loss


def classifier_calc_acc(pred, label, *, reduce_time=True):
    """JAX equivalent of Classifier.calc_acc (argmax glue, not a hot path)."""
    if reduce_time:
        label = label[:, -1, :]
    p_label = jnp.argmax(pred, axis=-1)
    label_idx = jnp.argmax(label, axis=-1)
    return jnp.mean((p_label == label_idx).astype(jnp.float32))


def _reference_loss(x, label, w, b, *, reduce_time=True):
    """Pure-JAX reference for correctness checking."""
    if reduce_time:
        feats = x[:, -1, :]
        lab = label[:, -1, :]
    else:
        feats = x
        lab = label
    pred = feats @ w + b
    y_pred = jnp.sum(pred * lab, axis=-1)
    loss = -jnp.mean(y_pred - jax.scipy.special.logsumexp(pred, axis=-1))
    return pred, loss


if __name__ == "__main__":
    key = jax.random.PRNGKey(0)
    B, T, D, C = 8, 8, 32, 8  # small shapes consistent with (B, T, D) -> (B, [T,] C)

    k_x, k_lab, k_w, k_b = jax.random.split(key, 4)
    x = jax.random.normal(k_x, (B, T, D), dtype=jnp.float32)
    lab_idx = jax.random.randint(k_lab, (B, T), 0, C)
    label = jax.nn.one_hot(lab_idx, C, dtype=jnp.float32)

    # Deterministic linear-head parameters (PyTorch nn.Linear-style uniform init)
    bound = 1.0 / (D ** 0.5)
    w = jax.random.uniform(k_w, (D, C), jnp.float32, -bound, bound)
    b = jax.random.uniform(k_b, (C,), jnp.float32, -bound, bound)

    # reduce_time = True path
    pred_rt, loss_rt = classifier_calc_loss(x, label, w, b, reduce_time=True)
    jax.block_until_ready((pred_rt, loss_rt))
    ref_pred_rt, ref_loss_rt = _reference_loss(x, label, w, b, reduce_time=True)
    assert pred_rt.shape == (B, C)
    assert jnp.allclose(pred_rt, ref_pred_rt, atol=1e-5, rtol=1e-5)
    assert jnp.allclose(loss_rt, ref_loss_rt, atol=1e-5, rtol=1e-5)

    # reduce_time = False path (whole time axis folded into rows)
    pred_seq, loss_seq = classifier_calc_loss(x, label, w, b, reduce_time=False)
    jax.block_until_ready((pred_seq, loss_seq))
    ref_pred_seq, ref_loss_seq = _reference_loss(x, label, w, b, reduce_time=False)
    assert pred_seq.shape == (B, T, C)
    assert jnp.allclose(pred_seq, ref_pred_seq, atol=1e-5, rtol=1e-5)
    assert jnp.allclose(loss_seq, ref_loss_seq, atol=1e-5, rtol=1e-5)

    # Multi-tile path with ragged N (N = 15, tile_n = 8 -> grid of 2 with
    # padded rows masked out of the loss).
    B2, T2 = 3, 5
    x_s = jax.random.normal(jax.random.PRNGKey(1), (B2, T2, D), dtype=jnp.float32)
    lab_s = jax.nn.one_hot(
        jax.random.randint(jax.random.PRNGKey(2), (B2, T2), 0, C), C,
        dtype=jnp.float32)
    pred_s, loss_s = classifier_calc_loss(x_s, lab_s, w, b,
                                          reduce_time=False, tile_n=8)
    jax.block_until_ready((pred_s, loss_s))
    ref_pred_s, ref_loss_s = _reference_loss(x_s, lab_s, w, b, reduce_time=False)
    assert jnp.allclose(pred_s, ref_pred_s, atol=1e-5, rtol=1e-5)
    assert jnp.allclose(loss_s, ref_loss_s, atol=1e-5, rtol=1e-5)

    # accuracy glue
    acc = classifier_calc_acc(pred_rt, label, reduce_time=True)
    jax.block_until_ready(acc)

    print("KERNEL_OK")
</pallas_src>

<mosaic_0001>
module attributes {stable_mosaic.version = 11 : i64} {
  func.func @_classifier_loss_kernel(%arg0: i32, %arg1: memref<8x32xf32, #tpu.memory_space<vmem>>, %arg2: memref<32x128xf32, #tpu.memory_space<vmem>>, %arg3: memref<1x128xf32, #tpu.memory_space<vmem>>, %arg4: memref<8x128xf32, #tpu.memory_space<vmem>>, %arg5: memref<8x128xf32, #tpu.memory_space<vmem>>, %arg6: memref<1x8x128xf32, #tpu.memory_space<vmem>>) attributes {dimension_semantics = [#tpu.dimension_semantics<parallel>], iteration_bounds = array<i64: 1>, scalar_prefetch = 0 : i64, scratch_operands = 0 : i64, tpu.core_type = #tpu.core_type<tc>, window_params = [{transform_indices = @transform_0, window_bounds = array<i64: 8, 32>}, {pipeline_mode = #tpu.pipeline_mode<synchronous>, transform_indices = @transform_1, window_bounds = array<i64: 32, 128>}, {pipeline_mode = #tpu.pipeline_mode<synchronous>, transform_indices = @transform_2, window_bounds = array<i64: 1, 128>}, {transform_indices = @transform_3, window_bounds = array<i64: 8, 128>}, {transform_indices = @transform_4, window_bounds = array<i64: 8, 128>}, {transform_indices = @transform_5, window_bounds = array<i64: 1, 8, 128>}]} {
    %c0 = arith.constant 0 : index
    %c0_0 = arith.constant 0 : index
    %0 = vector.load %arg1[%c0, %c0_0] : memref<8x32xf32, #tpu.memory_space<vmem>>, vector<8x32xf32>
    %c0_1 = arith.constant 0 : index
    %c0_2 = arith.constant 0 : index
    %1 = vector.load %arg2[%c0_1, %c0_2] : memref<32x128xf32, #tpu.memory_space<vmem>>, vector<32x128xf32>
    %cst = arith.constant dense<0.000000e+00> : vector<8x128xf32>
    %2 = tpu.matmul %0, %1, %cst {dimension_numbers = #tpu.dot_dimension_numbers<[1], [0], [0], [1], [0, 0, 1, 1], [], []>} : vector<8x32xf32>, vector<32x128xf32>, vector<8x128xf32> -> vector<8x128xf32>
    %c0_3 = arith.constant 0 : index
    %c0_4 = arith.constant 0 : index
    %3 = vector.load %arg3[%c0_3, %c0_4] : memref<1x128xf32, #tpu.memory_space<vmem>>, vector<1x128xf32>
    %4 = vector.broadcast %3 : vector<1x128xf32> to vector<8x128xf32>
    %5 = arith.addf %2, %4 : vector<8x128xf32>
    %c0_5 = arith.constant 0 : index
    %c0_6 = arith.constant 0 : index
    %6 = vector.load %arg5[%c0_5, %c0_6] : memref<8x128xf32, #tpu.memory_space<vmem>>, vector<8x128xf32>
    tpu.vector_store %arg5[%c0_5, %c0_6], %5 {strides = array<i32>} : memref<8x128xf32, #tpu.memory_space<vmem>>, vector<8x128xf32>,
    %c0_7 = arith.constant 0 : index
    %c0_8 = arith.constant 0 : index
    %7 = vector.load %arg4[%c0_7, %c0_8] : memref<8x128xf32, #tpu.memory_space<vmem>>, vector<8x128xf32>
    %8 = arith.mulf %5, %7 : vector<8x128xf32>
    %cst_9 = arith.constant dense<0.000000e+00> : vector<8xf32>
    %9 = vector.multi_reduction <add>, %8, %cst_9 [1] : vector<8x128xf32> to vector<8xf32>
    %10 = vector.shape_cast %9 : vector<8xf32> to vector<8x1xf32>
    %cst_10 = arith.constant dense<0xFF800000> : vector<8xf32>
    %11 = vector.multi_reduction <maximumf>, %5, %cst_10 [1] : vector<8x128xf32> to vector<8xf32>
    %12 = vector.shape_cast %11 : vector<8xf32> to vector<8x1xf32>
    %13 = vector.broadcast %12 : vector<8x1xf32> to vector<8x128xf32>
    %14 = arith.subf %5, %13 : vector<8x128xf32>
    %15 = math.exp %14 : vector<8x128xf32>
    %cst_11 = arith.constant dense<0.000000e+00> : vector<8xf32>
    %16 = vector.multi_reduction <add>, %15, %cst_11 [1] : vector<8x128xf32> to vector<8xf32>
    %17 = vector.shape_cast %16 : vector<8xf32> to vector<8x1xf32>
    %18 = math.log %17 : vector<8x1xf32>
    %19 = arith.addf %12, %18 : vector<8x1xf32>
    %20 = arith.subf %10, %19 : vector<8x1xf32>
    %c8_i32 = arith.constant 8 : i32
    %21 = arith.muli %arg0, %c8_i32 : i32
    %22 = tpu.iota {dimensions = array<i32: 0>} : vector<8x1xi32>
    %23 = vector.broadcast %21 : i32 to vector<8x1xi32>
    %24 = arith.addi %23, %22 : vector<8x1xi32>
    %c8_i32_12 = arith.constant 8 : i32
    %25 = vector.broadcast %c8_i32_12 : i32 to vector<8x1xi32>
    %26 = arith.cmpi slt, %24, %25 : vector<8x1xi32>
    %cst_13 = arith.constant 0.000000e+00 : f32
    %27 = vector.broadcast %cst_13 : f32 to vector<8x1xf32>
    %28 = arith.select %26, %20, %27 : vector<8x1xi1>, vector<8x1xf32>
    %29 = vector.shape_cast %28 : vector<8x1xf32> to vector<1x8x1xf32>
    %cst_14 = arith.constant dense<0.000000e+00> : vector<1xf32>
    %30 = vector.multi_reduction <add>, %29, %cst_14 [1, 2] : vector<1x8x1xf32> to vector<1xf32>
    %31 = vector.shape_cast %30 : vector<1xf32> to vector<1x1x1xf32>
    %32 = vector.extract %31[0, 0, 0] : f32 from vector<1x1x1xf32>
    %33 = vector.broadcast %32 : f32 to vector<1x1xf32>
    %34 = vector.shape_cast %33 : vector<1x1xf32> to vector<1x1x1xf32>
    %35 = vector.shape_cast %34 : vector<1x1x1xf32> to vector<1x1x1xf32>
    %36 = vector.broadcast %35 : vector<1x1x1xf32> to vector<1x8x128xf32>
    %c0_15 = arith.constant 0 : index
    %c0_16 = arith.constant 0 : index
    %c0_17 = arith.constant 0 : index
    %37 = vector.load %arg6[%c0_15, %c0_16, %c0_17] : memref<1x8x128xf32, #tpu.memory_space<vmem>>, vector<1x8x128xf32>
    tpu.vector_store %arg6[%c0_15, %c0_16, %c0_17], %36 {strides = array<i32>} : memref<1x8x128xf32, #tpu.memory_space<vmem>>, vector<1x8x128xf32>,
    return
  }
  func.func @transform_0(%arg0: i32) -> (i32, i32) {
    %c0_i32 = arith.constant 0 : i32
    %c0_i32_0 = arith.constant 0 : i32
    return %arg0, %c0_i32 : i32, i32
  }
  func.func @transform_1(%arg0: i32) -> (i32, i32) {
    %c0_i32 = arith.constant 0 : i32
    %c0_i32_0 = arith.constant 0 : i32
    %c0_i32_1 = arith.constant 0 : i32
    return %c0_i32, %c0_i32_0 : i32, i32
  }
  func.func @transform_2(%arg0: i32) -> (i32, i32) {
    %c0_i32 = arith.constant 0 : i32
    %c0_i32_0 = arith.constant 0 : i32
    %c0_i32_1 = arith.constant 0 : i32
    return %c0_i32, %c0_i32_0 : i32, i32
  }
  func.func @transform_3(%arg0: i32) -> (i32, i32) {
    %c0_i32 = arith.constant 0 : i32
    %c0_i32_0 = arith.constant 0 : i32
    return %arg0, %c0_i32 : i32, i32
  }
  func.func @transform_4(%arg0: i32) -> (i32, i32) {
    %c0_i32 = arith.constant 0 : i32
    %c0_i32_0 = arith.constant 0 : i32
    return %arg0, %c0_i32 : i32, i32
  }
  func.func @transform_5(%arg0: i32) -> (i32, i32, i32) {
    %c0_i32 = arith.constant 0 : i32
    %c0_i32_0 = arith.constant 0 : i32
    %c0_i32_1 = arith.constant 0 : i32
    return %arg0, %c0_i32, %c0_i32_0 : i32, i32, i32
  }
}

</mosaic_0001>

<bundles_post_ra>
// kernel: classifier_calc_loss.1
= control target key start
LH: loop header
LB: loop body
LE: loop exit
PB: predicated region body
PF: predicated region fallthrough
CT: control target
= control target key end

     0   :  { %v218_v3 = vmov 0.0|0.0   ;;  %vm219_vm0 = vmmov 0   ;;  %v220_v6 = vmov 0.0   ;;  %s288_s0 = inlined_call_operand.vmem [shape: f32[8,32], index: 0, kind: input, shape index: {}]   ;;  %s289_s1 = inlined_call_operand.vmem [shape: f32[32,128], index: 1, kind: input, shape index: {}]   ;;  %s290_s2 = inlined_call_operand.vmem [shape: f32[1,128], index: 2, kind: input, shape index: {}]   ;;  %s291_s3 = inlined_call_operand.vmem [shape: f32[8,128], index: 3, kind: input, shape index: {}]   ;;  %s292_s4 = inlined_call_operand.hbm [shape: f32[8,128], index: 4, kind: output, shape index: {0}]   ;;  %s293_s5 = inlined_call_operand.vmem [shape: f32[1,8,128], index: 5, kind: output, shape index: {1}]  }
   0x1   :  { %v21_v0 = vld [vmem:[%s289_s1] sm:$0xff]  ;;  %v22_v1 = vld [vmem:[%s289_s1 + $0x8] sm:$0xff]  ;;  %v23_v2 = vld [vmem:[%s289_s1 + $0x10] sm:$0xff]  ;;  %178 = vmatprep.subr.bf16.mxu0 %v218_v3  ;;  %175 = vmatprep.mubr.msk.f32.mxu0 %vm219_vm0, %v220_v6 }
   0x2   :  { %v179_v4 = vpack.c.bf16 %v22_v1, %v21_v0  ;;  %v24_v5 = vld [vmem:[%s289_s1 + $0x18] sm:$0xff] }
   0x3   :  { %11 = vsyncpa [#allocation3], 0  ;;  %v182_v7 = vpack.c.bf16 %v24_v5, %v23_v2  ;;  %v20_v8 = vld [vmem:[%s288_s0] sm:$0xff]  ;;  %vm32_vm1 = vcmask 261120   ;;  %vm129_vm2 = vcmask 7168   ;;  %s221_s0 = smov [#allocation2]  }
   0x4   :  { %180 = vmatpush3.bf16.msra.mxu0 %v179_v4  ;;  %v160_v9 = vld [vmem:[%s290_s2] ss:$0 sm:$0xff]  ;;  %s148_s2 = sshll.u32 %s221_s0, 4  ;;  %s149_s2 = int_to_ptr.vmem [resolvable:$true] %s148_s2 }
   0x5   :  { %181 = vmatprep.subr.bf16.mxu0 %v218_v3  ;;  %v107_v11 = vld [vmem:[%s291_s3] sm:$0xff]  ;;  %s194_s3 = scalar_lea.vmem %s149_s2, 128  ;;  %p199_p1 = scmp.lt.s32.totalorder %s149_s2, %s149_s2 }
   0x6   :  { %p195_p0 = scmp.ne.s32.totalorder %s149_s2, %s194_s3  ;;  %p200_p2 = scmp.lt.s32.totalorder %s194_s3, %s194_s3 }
   0x8   :  { %183 = vmatpush3.bf16.msra.mxu0 %v182_v7  ;;  %p201_p3 = por %p200_p2, %p199_p1 }
   0xa   :  { %p202_p4 = pnand %p201_p3, %p195_p0 }
   0xb   :  { %176 = vmatmul.mubr.msk.f32.vlgmr.msra.gmra.mrb[0].mxu0 %vm32_vm1, %v20_v8 }
  0xde   :  { %v102_v10 = vpop.f32.mrb[0].mxu0 }
  0xdf   :  { %v103_v12 = vadd.f32 %v160_v9, %v102_v10  ;;  %v177_v13 = vpop.f32.mrb[1].mxu0 }
  0xe1   :  { %106 = vst [vmem:[#allocation2] sm:$0xff] %v103_v12  ;;  %111 = vmax.xlane.f32.xlu0 %v103_v12  ;;  %v108_v14 = vmul.f32 %v107_v11, %v103_v12 }
  0xe3   :  { %109 = vadd.xlane.f32.xlu1 %v108_v14 }
 0x16e   :  { %v112_v15 = vpop.xlane.xlu0 %111 }
 0x16f   :  { %v113_v16 = vsub.f32 %v103_v12, %v112_v15 }
 0x170   :  { %v110_v23 = vpop.xlane.xlu1 %109 }
 0x171   :  { %v114_v17 = vmul.f32 1.442695, %v113_v16 }
 0x173   :  { %190 = vpow2.f32 %v114_v17 }
 0x17d   :  { %v191_v18 = vpop.eup %190 }
 0x17e   :  { %116 = vadd.xlane.f32.xlu0 %v191_v18 }
 0x20b   :  { %v117_v19 = vpop.xlane.xlu0 %116 }
 0x20c   :  { %192 = vlog2.f32 %v117_v19 }
 0x216   :  { %v193_v20 = vpop.eup %192 }
 0x217   :  { %v119_v21 = vmul.f32 0.6931472, %v193_v20 }
 0x219   :  { %v120_v22 = vadd.f32 %v119_v21, %v112_v15 }
 0x21b   :  { %v121_v24 = vsub.f32 %v110_v23, %v120_v22 }
 0x21d   :  { %v130_v25 = vsel %vm129_vm2, %v121_v24, 0.0 }
 0x21e   :  { %131 = vadd.xlane.f32.xlu1 %v130_v25 }
 0x21f   :  { %205 = shalt.err (!%p202_p4)
}
 0x220   :  { %s206_s8 = scalar_lea.hbm %s292_s4, 128 }
 0x221   :  { %p207_p5 = scmp.ne.s32.totalorder %s292_s4, %s206_s8  ;;  %p210_p6 = scmp.lt.u32.totalorder %s206_s8, %s292_s4 }
 0x223   :  { %p212_p7 = pnand %p210_p6, %p207_p5 }
 0x225   :  { %215 = shalt.err (!%p212_p7)
}
 0x226   :  { %151 = dma.vmem_to_hbm [thread:$0]  %s149_s2, 128, %s292_s4, [#allocation3]  }
 0x2ab   :  { %v132_v26 = vpop.xlane.xlu1 %131 }
 0x2ac   :  { %v133_v27 = vrot.slane %v132_v26, 4 }
 0x2ae   :  { %v134_v28 = vadd.f32 %v133_v27, %v132_v26 }
 0x2b0   :  { %v135_v29 = vrot.slane %v134_v28, 2 }
 0x2b2   :  { %v136_v30 = vadd.f32 %v135_v29, %v134_v28 }
 0x2b4   :  { %v137_v31 = vrot.slane %v136_v30, 1 }
 0x2b6   :  { %v138_v32 = vadd.f32 %v137_v31, %v136_v30 }
 0x2b8   :  { %184 = vpush %v138_v32 }
 0x2e9   :  { %s185_s15 = spop %184 }
 0x2ea   :  { %v140_v33 = vstv %s185_s15 }
 0x2eb   :  { %141 = vst [vmem:[%s293_s5] sm:$0xff] %v140_v33 }
 0x2ec   :  { %216 = dma.done.wait [#allocation3], 128  }
 0x2ed   :  { %217 = vsyncadd [#allocation3], 4294967168 }
 0x2ee   :  { %159 = vsyncpa [#allocation3], 1 }

</bundles_post_ra>
